<compile_context>
chip_gen: v7x
topology: tpu7x:2x2x1
jax: 0.10.0
libtpu: 0.0.40
codegen_flags: <defaults>
</compile_context>

<pallas_src>
import numpy as np
import jax
import jax.numpy as jnp
from jax.experimental import pallas as pl
from jax.experimental.pallas import tpu as pltpu


# ----------------------------------------------------------------------------
# Schedule construction (plain numpy "glue", mirrors diffusion_utils)
# ----------------------------------------------------------------------------
def cosine_beta_schedule_discrete(timesteps: int, s: float = 0.008) -> np.ndarray:
    """Cosine schedule as in DiGress / Nichol & Dhariwal. Returns (timesteps+1,)."""
    steps = timesteps + 2
    x = np.linspace(0, steps, steps)
    alphas_cumprod = np.cos(0.5 * np.pi * ((x / steps) + s) / (1 + s)) ** 2
    alphas_cumprod = alphas_cumprod / alphas_cumprod[0]
    alphas = alphas_cumprod[1:] / alphas_cumprod[:-1]
    betas = 1.0 - alphas
    return betas.squeeze().astype(np.float64)


def _round_up(x: int, m: int) -> int:
    return ((x + m - 1) // m) * m


# ----------------------------------------------------------------------------
# Pallas kernel: fused gather of betas and alphas_bar via one-hot lane reduce
#   idx_ref:   (TB, 1)     int32   (already rounded + clipped in the wrapper)
#   table_ref: (2, T_pad)  float32 (row 0 = betas, row 1 = alphas_bar)
#   out_ref:   (TB, 2)     float32 (col 0 = betas[idx], col 1 = alphas_bar[idx])
# ----------------------------------------------------------------------------
def _fused_lookup_kernel(idx_ref, table_ref, out_ref):
    idx = idx_ref[...]                                   # (TB, 1) i32
    table = table_ref[...]                               # (2, T_pad) f32
    TB = idx_ref.shape[0]
    T_pad = table_ref.shape[1]

    lane = jax.lax.broadcasted_iota(jnp.int32, (TB, T_pad), 1)
    mask = lane == idx                                   # (TB, T_pad) one-hot

    zero = jnp.float32(0.0)
    betas_row = table[0:1, :]                            # (1, T_pad)
    abar_row = table[1:2, :]                             # (1, T_pad)

    betas_val = jnp.sum(jnp.where(mask, betas_row, zero), axis=-1, keepdims=True)
    abar_val = jnp.sum(jnp.where(mask, abar_row, zero), axis=-1, keepdims=True)

    out_ref[:, 0:1] = betas_val                          # (TB, 1)
    out_ref[:, 1:2] = abar_val                           # (TB, 1)


def _fused_lookup_pallas(idx_flat_i32: jax.Array, tables_2d: jax.Array):
    """idx_flat_i32: (B, 1) int32; tables_2d: (2, T_pad) f32 -> (betas, abar) (B,) each."""
    B = idx_flat_i32.shape[0]
    T_pad = tables_2d.shape[1]

    # Batch tiling: single block for small B; 512-row parallel tiles for big B
    # (shards across both TensorCores on v7x; harmless elsewhere).
    if B <= 512:
        TB = _round_up(max(B, 8), 8)
    else:
        TB = 512
    B_pad = _round_up(B, TB)

    if B_pad != B:
        idx_padded = jnp.zeros((B_pad, 1), jnp.int32).at[:B].set(idx_flat_i32)
    else:
        idx_padded = idx_flat_i32

    grid = (B_pad // TB,)
    out = pl.pallas_call(
        _fused_lookup_kernel,
        out_shape=jax.ShapeDtypeStruct((B_pad, 2), jnp.float32),
        grid=grid,
        in_specs=[
            pl.BlockSpec((TB, 1), lambda i: (i, 0)),        # int32 indices
            pl.BlockSpec((2, T_pad), lambda i: (0, 0)),     # stacked tables
        ],
        out_specs=pl.BlockSpec((TB, 2), lambda i: (i, 0)),
        compiler_params=pltpu.CompilerParams(
            dimension_semantics=("parallel",)),
        cost_estimate=pl.CostEstimate(
            flops=4 * B_pad * T_pad,
            transcendentals=0,
            bytes_accessed=B_pad * 4 + 2 * T_pad * 4 + B_pad * 8),
    )(idx_padded, tables_2d)

    return out[:B, 0], out[:B, 1]


# ----------------------------------------------------------------------------
# Module equivalent
# ----------------------------------------------------------------------------
class PredefinedNoiseScheduleDiscrete:
    """JAX/Pallas port. Lookup tables are built once in __init__ (no learning)."""

    def __init__(self, noise_schedule: str, timesteps: int):
        self.timesteps = timesteps
        if noise_schedule == "cosine":
            betas = cosine_beta_schedule_discrete(timesteps)
        else:
            raise NotImplementedError(noise_schedule)

        self.betas = jnp.asarray(betas, dtype=jnp.float32)              # (T+1,)
        self.alphas = 1.0 - jnp.clip(self.betas, 0.0, 0.9999)
        log_alpha_bar = jnp.cumsum(jnp.log(self.alphas), axis=0)
        self.alphas_bar = jnp.exp(log_alpha_bar)                        # (T+1,)

        # One stacked, lane-padded table so the fused kernel issues a single
        # HBM->VMEM table DMA. Padded entries are unreachable (idx is clipped).
        n = self.betas.shape[0]
        t_pad = max(128, _round_up(n, 128))
        self._t_pad = t_pad
        tables = jnp.zeros((2, t_pad), jnp.float32)
        tables = tables.at[0, :n].set(self.betas)
        tables = tables.at[1, :n].set(self.alphas_bar)
        self._tables_2d = tables

    # --- index prep (kept off the VMEM/VPU path) -----------------------------
    def _indices(self, t_normalized, t_int):
        assert int(t_normalized is None) + int(t_int is None) == 1
        if t_int is None:
            t = jnp.asarray(t_normalized, dtype=jnp.float32)
            idx = jnp.round(t * self.timesteps)
        else:
            idx = jnp.asarray(t_int)
        # Clip to the valid table range (matches/robustifies PyTorch indexing,
        # and makes t_normalized == 1.0 hit betas[-1] instead of padding).
        return jnp.clip(idx.astype(jnp.int32), 0, self.timesteps)

    def _lookup_both(self, t_normalized=None, t_int=None):
        idx = self._indices(t_normalized, t_int)
        orig_shape = idx.shape
        idx_flat = idx.reshape(-1, 1)
        betas_flat, abar_flat = _fused_lookup_pallas(idx_flat, self._tables_2d)
        return betas_flat.reshape(orig_shape), abar_flat.reshape(orig_shape)

    # --- public API -----------------------------------------------------------
    def forward(self, t_normalized=None, t_int=None):
        return self._lookup_both(t_normalized=t_normalized, t_int=t_int)[0]

    __call__ = forward

    def get_alpha_bar(self, t_normalized=None, t_int=None):
        return self._lookup_both(t_normalized=t_normalized, t_int=t_int)[1]

    def get_betas_and_alpha_bar(self, t_normalized=None, t_int=None):
        """Fused hot path: both lookups from a single pallas_call."""
        return self._lookup_both(t_normalized=t_normalized, t_int=t_int)


# ----------------------------------------------------------------------------
# Demo / self-check
# ----------------------------------------------------------------------------
if __name__ == "__main__":
    timesteps = 50
    sched = PredefinedNoiseScheduleDiscrete("cosine", timesteps)

    key = jax.random.PRNGKey(0)
    B = 8
    t_normalized = jax.random.uniform(key, (B, 1), dtype=jnp.float32)   # in [0, 1)

    # Reference indices (same clipping semantics).
    idx_ref = jnp.clip(jnp.round(t_normalized * timesteps).astype(jnp.int32),
                       0, timesteps).reshape(-1)

    # forward() path
    out = jax.block_until_ready(sched(t_normalized=t_normalized))
    ref = sched.betas[idx_ref].reshape(B, 1)
    assert out.shape == (B, 1) and out.dtype == jnp.float32
    np.testing.assert_allclose(np.asarray(out), np.asarray(ref), rtol=1e-6, atol=1e-7)

    # Fused path (single pallas_call for both tables)
    b_fused, a_fused = sched.get_betas_and_alpha_bar(t_normalized=t_normalized)
    b_fused = jax.block_until_ready(b_fused)
    a_fused = jax.block_until_ready(a_fused)
    ref_abar = sched.alphas_bar[idx_ref].reshape(B, 1)
    np.testing.assert_allclose(np.asarray(b_fused), np.asarray(ref), rtol=1e-6, atol=1e-7)
    np.testing.assert_allclose(np.asarray(a_fused), np.asarray(ref_abar), rtol=1e-6, atol=1e-7)

    # t_int path
    t_int = jnp.arange(B, dtype=jnp.int32).reshape(B, 1) % (timesteps + 1)
    out_int = jax.block_until_ready(sched(t_int=t_int))
    ref_int = sched.betas[t_int.reshape(-1)].reshape(B, 1)
    np.testing.assert_allclose(np.asarray(out_int), np.asarray(ref_int), rtol=1e-6, atol=1e-7)

    # alpha_bar path
    abar = jax.block_until_ready(sched.get_alpha_bar(t_normalized=t_normalized))
    np.testing.assert_allclose(np.asarray(abar), np.asarray(ref_abar), rtol=1e-6, atol=1e-7)

    # Boundary: t_normalized == 1.0 must hit betas[timesteps], not padding.
    t_one = jnp.ones((2, 1), jnp.float32)
    out_one = jax.block_until_ready(sched(t_normalized=t_one))
    ref_one = jnp.full((2, 1), sched.betas[timesteps], dtype=jnp.float32)
    np.testing.assert_allclose(np.asarray(out_one), np.asarray(ref_one), rtol=1e-6, atol=1e-7)

    print("KERNEL_OK")
</pallas_src>

<mosaic_0001>
module attributes {stable_mosaic.version = 11 : i64} {
  func.func @_fused_lookup_kernel(%arg0: i32, %arg1: memref<8x1xi32, #tpu.memory_space<vmem>>, %arg2: memref<2x128xf32, #tpu.memory_space<vmem>>, %arg3: memref<8x2xf32, #tpu.memory_space<vmem>>) attributes {dimension_semantics = [#tpu.dimension_semantics<parallel>], iteration_bounds = array<i64: 1>, scalar_prefetch = 0 : i64, scratch_operands = 0 : i64, tpu.core_type = #tpu.core_type<tc>, window_params = [{transform_indices = @transform_0, window_bounds = array<i64: 8, 1>}, {pipeline_mode = #tpu.pipeline_mode<synchronous>, transform_indices = @transform_1, window_bounds = array<i64: 2, 128>}, {transform_indices = @transform_2, window_bounds = array<i64: 8, 2>}]} {
    %c0 = arith.constant 0 : index
    %c0_0 = arith.constant 0 : index
    %0 = vector.load %arg1[%c0, %c0_0] : memref<8x1xi32, #tpu.memory_space<vmem>>, vector<8x1xi32>
    %c0_1 = arith.constant 0 : index
    %c0_2 = arith.constant 0 : index
    %1 = vector.load %arg2[%c0_1, %c0_2] : memref<2x128xf32, #tpu.memory_space<vmem>>, vector<2x128xf32>
    %2 = tpu.iota {dimensions = array<i32: 1>} : vector<8x128xi32>
    %3 = vector.broadcast %0 : vector<8x1xi32> to vector<8x128xi32>
    %4 = arith.cmpi eq, %2, %3 : vector<8x128xi32>
    %5 = vector.extract_strided_slice %1 {offsets = [0, 0], sizes = [1, 128], strides = [1, 1]} : vector<2x128xf32> to vector<1x128xf32>
    %6 = vector.extract_strided_slice %1 {offsets = [1, 0], sizes = [1, 128], strides = [1, 1]} : vector<2x128xf32> to vector<1x128xf32>
    %cst = arith.constant 0.000000e+00 : f32
    %7 = vector.shape_cast %5 : vector<1x128xf32> to vector<1x128xf32>
    %8 = vector.broadcast %7 : vector<1x128xf32> to vector<8x128xf32>
    %9 = vector.broadcast %cst : f32 to vector<8x128xf32>
    %10 = arith.select %4, %8, %9 : vector<8x128xi1>, vector<8x128xf32>
    %cst_3 = arith.constant dense<0.000000e+00> : vector<8xf32>
    %11 = vector.multi_reduction <add>, %10, %cst_3 [1] : vector<8x128xf32> to vector<8xf32>
    %12 = vector.shape_cast %11 : vector<8xf32> to vector<8x1xf32>
    %cst_4 = arith.constant 0.000000e+00 : f32
    %13 = vector.shape_cast %6 : vector<1x128xf32> to vector<1x128xf32>
    %14 = vector.broadcast %13 : vector<1x128xf32> to vector<8x128xf32>
    %15 = vector.broadcast %cst_4 : f32 to vector<8x128xf32>
    %16 = arith.select %4, %14, %15 : vector<8x128xi1>, vector<8x128xf32>
    %cst_5 = arith.constant dense<0.000000e+00> : vector<8xf32>
    %17 = vector.multi_reduction <add>, %16, %cst_5 [1] : vector<8x128xf32> to vector<8xf32>
    %18 = vector.shape_cast %17 : vector<8xf32> to vector<8x1xf32>
    %c0_6 = arith.constant 0 : index
    %c0_7 = arith.constant 0 : index
    %19 = vector.load %arg3[%c0_6, %c0_7] : memref<8x2xf32, #tpu.memory_space<vmem>>, vector<8x1xf32>
    tpu.vector_store %arg3[%c0_6, %c0_7], %12 {strides = array<i32>} : memref<8x2xf32, #tpu.memory_space<vmem>>, vector<8x1xf32>,
    %c0_8 = arith.constant 0 : index
    %c1 = arith.constant 1 : index
    %20 = vector.load %arg3[%c0_8, %c1] : memref<8x2xf32, #tpu.memory_space<vmem>>, vector<8x1xf32>
    tpu.vector_store %arg3[%c0_8, %c1], %18 {strides = array<i32>} : memref<8x2xf32, #tpu.memory_space<vmem>>, vector<8x1xf32>,
    return
  }
  func.func @transform_0(%arg0: i32) -> (i32, i32) {
    %c0_i32 = arith.constant 0 : i32
    %c0_i32_0 = arith.constant 0 : i32
    return %arg0, %c0_i32 : i32, i32
  }
  func.func @transform_1(%arg0: i32) -> (i32, i32) {
    %c0_i32 = arith.constant 0 : i32
    %c0_i32_0 = arith.constant 0 : i32
    %c0_i32_1 = arith.constant 0 : i32
    return %c0_i32, %c0_i32_0 : i32, i32
  }
  func.func @transform_2(%arg0: i32) -> (i32, i32) {
    %c0_i32 = arith.constant 0 : i32
    %c0_i32_0 = arith.constant 0 : i32
    return %arg0, %c0_i32 : i32, i32
  }
}

</mosaic_0001>

<bundles_post_ra>
// kernel: tpu_custom_call.1
= control target key start
LH: loop header
LB: loop body
LE: loop exit
PB: predicated region body
PF: predicated region fallthrough
CT: control target
= control target key end

     0   :  { %v43_v0 = vmov 0   ;;  %v13_v2 = vlaneseq  ;;  %vm33_vm1 = vcmask 7168   ;;  %vm35_vm2 = vcmask 15368   ;;  %s71_s0 = inlined_call_operand.vmem [shape: s32[8,1], index: 0, kind: input, shape index: {}]   ;;  %s72_s1 = inlined_call_operand.vmem [shape: f32[2,128], index: 1, kind: input, shape index: {}]   ;;  %s73_s2 = inlined_call_operand.vmem [shape: f32[8,2], index: 2, kind: output, shape index: {}]  }
   0x1   :  { %42 = vset.pattern.permute.xlu0 %v43_v0  ;;  %v11_v1 = vld [vmem:[%s71_s0] sm:$0xff] }
   0x2   :  { %16 = vperm.xlu0 %42, %v11_v1   ;;  %v20_v3 = vshrl.u32 %v13_v2, 7  ;;  %v12_v6 = vld [vmem:[%s72_s1] sm:$0x3]  ;;  %v14_v7 = vand.u32 127, %v13_v2 }
   0x4   :  { %v28_v4 = vsub.s32 1, %v20_v3  ;;  %v21_v5 = vsub.s32 0, %v20_v3 }
   0x6   :  { %v29_v8 = vrot.slane %v12_v6, %v28_v4  ;;  %v22_v9 = vrot.slane %v12_v6, %v21_v5 }
  0x81   :  { %v17_v10 = vpop.permute.xlu0 %16 }
  0x82   :  { %vm18_vm0 = vcmp.eq.s32.totalorder %v14_v7, %v17_v10 }
  0x83   :  { %v30_v11 = vsel %vm18_vm0, %v29_v8, 0.0  ;;  %v23_v12 = vsel %vm18_vm0, %v22_v9, 0.0 }
  0x84   :  { %31 = vadd.xlane.f32.xlu1 %v30_v11  ;;  %24 = vadd.xlane.f32.xlu0 %v23_v12 }
 0x111   :  { %v32_v13 = vpop.xlane.xlu1 %31  ;;  %v25_v14 = vpop.xlane.xlu0 %24 }
 0x112   :  { %34 = vst.msk [vmem:[%s73_s2] sm:$0xff] %vm33_vm1, %v25_v14 }
 0x113   :  { %36 = vst.msk [vmem:[%s73_s2] sm:$0xff] %vm35_vm2, %v32_v13 }

</bundles_post_ra>
